<compile_context>
chip_gen: v5e
topology: v5e:2x2
jax: 0.10.0
libtpu: 0.0.40
codegen_flags: <defaults>
</compile_context>

<pallas_src>
import functools

import jax
import jax.numpy as jnp
from jax.experimental import pallas as pl
from jax.experimental.pallas import tpu as pltpu


def _round_up(x, m):
    return ((x + m - 1) // m) * m


def _pick_batch_block(batch, nodes, mxu_tile):
    """Largest divisor bb of `batch` with bb*nodes <= mxu_tile, preferring
    grid = batch // bb >= 2 (megacore sharding + DMA/compute pipelining)."""
    divisors = [d for d in range(1, batch + 1) if batch % d == 0]
    fits = [d for d in divisors if d * nodes <= mxu_tile] or [1]
    bb = max(fits)
    if bb == batch and batch > 1:
        bb = max(d for d in divisors if d < batch)
    return bb


def _graphconv1d_kernel(x_ref, wn_ref, shn_ref, wft_ref, shc_ref, o_ref,
                        a_scr, *, nodes, batch_block):
    """One batch chunk.

    x_ref : (bb*N, Cp) io dtype, channels on the lane axis.
    wn_ref: (N, N)  node-conv weight (BN scale folded), matmul dtype.
    shn_ref: (N, 1) f32 node shift.   wft_ref: (Cp, Cp) feat weight^T fused.
    shc_ref: (1, Cp) f32 channel shift.  a_scr: (bb*N, Cp) f32 scratch.
    """
    # Node conv + ReLU + residual, per-sample (N,N)@(N,Cp) — no kron zeros.
    for b in range(batch_block):
        lo = b * nodes
        xb = x_ref[lo:lo + nodes, :]                         # (N, Cp)
        z = jnp.dot(wn_ref[...], xb.astype(wn_ref.dtype),
                    preferred_element_type=jnp.float32)      # (N, Cp) f32
        z = jnp.maximum(z + shn_ref[...], 0.0)
        a_scr[lo:lo + nodes, :] = z + xb.astype(jnp.float32)  # residual, f32

    # Feat conv (+ folded BN scale): a @ Wf_fused^T, channels stay on lanes.
    a = a_scr[...]                                           # (bb*N, Cp) f32
    w = jnp.dot(a.astype(wft_ref.dtype), wft_ref[...],
                preferred_element_type=jnp.float32)          # (bb*N, Cp) f32
    o_ref[...] = jnp.maximum(w + shc_ref[...], 0.0).astype(o_ref.dtype)


def fold_graphconv1d_params(wn, bn_bias, bn_n, wf, bf_bias, bn_c, *,
                            matmul_dtype=jnp.bfloat16, eps=1e-5):
    """Fold eval-mode BN (+ conv bias) into the weights ONCE (hoisted out of
    the per-forward path).  Returns device arrays ready for the kernel."""
    N = wn.shape[0]
    C = wf.shape[0]
    Cp = _round_up(C, 128)       # lane-dense channel extent

    gn, betn, mun, varn = bn_n
    scale_n = gn / jnp.sqrt(varn + eps)                      # (N,)
    shift_n = betn - mun * scale_n + bn_bias * scale_n       # (N,)

    gc, betc, muc, varc = bn_c
    scale_c = gc / jnp.sqrt(varc + eps)                      # (C,)
    shift_c = betc - muc * scale_c + bf_bias * scale_c       # (C,)

    wn_fused = (scale_n[:, None] * wn).astype(matmul_dtype)  # (N, N)
    wft_fused = wf.T * scale_c[None, :]                      # (C, C) == (scale*Wf)^T
    if Cp != C:
        wft_fused = jnp.pad(wft_fused, ((0, Cp - C), (0, Cp - C)))
        shift_c = jnp.pad(shift_c, (0, Cp - C))
    wft_fused = wft_fused.astype(matmul_dtype)               # (Cp, Cp)

    return {
        "wn": wn_fused,
        "wft": wft_fused,
        "shn": shift_n.reshape(N, 1).astype(jnp.float32),
        "shc": shift_c.reshape(1, Cp).astype(jnp.float32),
        "channels": int(C),
    }


def graphconv1d_apply(x, params, *, batch_block=None, io_dtype=jnp.bfloat16,
                      mxu_tile=256):
    """x: (B, C, N).  Returns (B, C, N) in `io_dtype`."""
    B, C, N = x.shape
    assert C == params["channels"], "params were folded for a different C"
    assert N % 8 == 0, "nodes must be a multiple of 8 (sublane tiling)"
    # TODO(synk): pad N to a multiple of 8 to support arbitrary node counts.

    wn_f, wft_f = params["wn"], params["wft"]
    shn, shc = params["shn"], params["shc"]
    Cp = wft_f.shape[0]
    mm_dtype = wft_f.dtype

    bb = _pick_batch_block(B, N, mxu_tile) if batch_block is None else batch_block
    assert B % bb == 0, "batch_block must divide B"
    bbN = bb * N
    grid = B // bb

    io_bytes = jnp.dtype(io_dtype).itemsize
    mm_bytes = jnp.dtype(mm_dtype).itemsize

    # Layout plumbing (XLA side): (B, C, N) -> (B*N, Cp) slab, channels on
    # lanes, padded lanes are zero, cast to the I/O dtype.
    x2 = jnp.swapaxes(x, 1, 2).reshape(B * N, C)
    if Cp != C:
        x2 = jnp.pad(x2, ((0, 0), (0, Cp - C)))
    x2 = x2.astype(io_dtype)

    # FLOPs actually executed (no kron zeros) and bytes actually moved
    # (weights are fetched once — constant index_map).
    flops = 2 * B * N * N * Cp + 2 * B * N * Cp * Cp
    bytes_accessed = (2 * B * N * Cp * io_bytes
                      + (N * N + Cp * Cp) * mm_bytes
                      + (N + Cp) * 4)

    # Per-step VMEM footprint: double-buffered x/out blocks, f32 scratch +
    # intermediates, weights (assume worst-case double buffering).
    tile = bbN * Cp
    footprint = (4 * tile * io_bytes            # x + out blocks, 2 bufs each
                 + 5 * tile * 4                 # f32 scratch + intermediates
                 + 2 * (N * N + Cp * Cp) * mm_bytes
                 + 2 * (N + Cp) * 4)
    vmem_limit = int(min(max(2 * footprint, 32 << 20), 64 << 20))

    kernel = functools.partial(_graphconv1d_kernel, nodes=N, batch_block=bb)

    def build(single_buffer_weights):
        def const_spec(shape):
            # Grid-invariant operands: constant index_map; single-buffer them
            # when supported to free VMEM for bigger batch chunks.
            if single_buffer_weights:
                return pl.BlockSpec(shape, lambda i: (0, 0),
                                    pipeline_mode=pl.Buffered(1))
            return pl.BlockSpec(shape, lambda i: (0, 0))

        return pl.pallas_call(
            kernel,
            out_shape=jax.ShapeDtypeStruct((B * N, Cp), io_dtype),
            grid_spec=pltpu.PrefetchScalarGridSpec(
                num_scalar_prefetch=0,
                grid=(grid,),
                in_specs=[
                    pl.BlockSpec((bbN, Cp), lambda i: (i, 0)),   # x chunk
                    const_spec((N, N)),                          # node weight
                    const_spec((N, 1)),                          # node shift
                    const_spec((Cp, Cp)),                        # feat weight^T
                    const_spec((1, Cp)),                         # chan shift
                ],
                out_specs=pl.BlockSpec((bbN, Cp), lambda i: (i, 0)),
                scratch_shapes=[pltpu.VMEM((bbN, Cp), jnp.float32)],
            ),
            compiler_params=pltpu.CompilerParams(
                dimension_semantics=("parallel",),
                vmem_limit_bytes=vmem_limit),
            cost_estimate=pl.CostEstimate(
                flops=flops, transcendentals=0,
                bytes_accessed=bytes_accessed),
        )

    try:
        out2 = build(True)(x2, wn_f, shn, wft_f, shc)
    except Exception:
        # pipeline_mode=pl.Buffered(1) not supported on this jax build;
        # fall back to default double-buffering (correctness unchanged).
        out2 = build(False)(x2, wn_f, shn, wft_f, shc)

    # (B*N, Cp) -> (B, C, N), matching the module's NCL output layout.
    out2 = out2[:, :C]
    return jnp.swapaxes(out2.reshape(B, N, C), 1, 2)


def graphconv1d(x, wn, bn_bias, bn_n, wf, bf_bias, bn_c, *,
                matmul_dtype=jnp.bfloat16, io_dtype=jnp.bfloat16,
                batch_block=None, mxu_tile=256, eps=1e-5):
    """Convenience one-shot entry (folds weights every call — prefer
    fold_graphconv1d_params() + graphconv1d_apply() for repeated forwards)."""
    params = fold_graphconv1d_params(wn, bn_bias, bn_n, wf, bf_bias, bn_c,
                                     matmul_dtype=matmul_dtype, eps=eps)
    return graphconv1d_apply(x, params, batch_block=batch_block,
                             io_dtype=io_dtype, mxu_tile=mxu_tile)


def reference(x, wn, bn_bias, bn_n, wf, bf_bias, bn_c):
    """Pure-JAX f32 reference mirroring the PyTorch forward (eval-mode BN)."""
    eps = 1e-5
    gn, betn, mun, varn = bn_n
    gc, betc, muc, varc = bn_c
    out = jnp.swapaxes(x, 1, 2)                                   # (B, N, C)
    out = jnp.einsum('nm,bmc->bnc', wn, out) + bn_bias[None, :, None]
    out = gn[None, :, None] * (out - mun[None, :, None]) / jnp.sqrt(
        varn[None, :, None] + eps) + betn[None, :, None]
    out = jnp.maximum(out, 0.0)
    out = jnp.swapaxes(out, 1, 2) + x                             # (B, C, N)
    out2 = jnp.einsum('cd,bdn->bcn', wf, out) + bf_bias[None, :, None]
    out2 = gc[None, :, None] * (out2 - muc[None, :, None]) / jnp.sqrt(
        varc[None, :, None] + eps) + betc[None, :, None]
    return jnp.maximum(out2, 0.0)


if __name__ == "__main__":
    # Realistic GloRe-like ratio at small scale: channels >> nodes.
    B, C, N = 2, 128, 16   # batch, channels, nodes

    key = jax.random.PRNGKey(0)
    kx, kwn, kbn, kwf, kbf, kg1, kg2 = jax.random.split(key, 7)

    x = jax.random.normal(kx, (B, C, N), dtype=jnp.float32)

    # Conv1d(nodes, nodes, kernel_size=1) -> weight (N, N), bias (N,)
    wn = jax.random.normal(kwn, (N, N), dtype=jnp.float32) * 0.1
    bn_bias = jax.random.normal(kbn, (N,), dtype=jnp.float32) * 0.1
    # Conv1d(channels, channels, kernel_size=1) -> weight (C, C), bias (C,)
    wf = jax.random.normal(kwf, (C, C), dtype=jnp.float32) * 0.1
    bf_bias = jax.random.normal(kbf, (C,), dtype=jnp.float32) * 0.1

    # BatchNorm1d params (eval mode): gamma, beta, running_mean, running_var
    bn_n = (1.0 + 0.05 * jax.random.normal(kg1, (N,), dtype=jnp.float32),
            jnp.zeros((N,), jnp.float32),
            jnp.zeros((N,), jnp.float32),
            jnp.ones((N,), jnp.float32))
    bn_c = (1.0 + 0.05 * jax.random.normal(kg2, (C,), dtype=jnp.float32),
            jnp.zeros((C,), jnp.float32),
            jnp.zeros((C,), jnp.float32),
            jnp.ones((C,), jnp.float32))

    ref = reference(x, wn, bn_bias, bn_n, wf, bf_bias, bn_c)

    # Exact-semantics check: f32 matmuls + f32 I/O (tight tolerance).
    out_f32 = graphconv1d(x, wn, bn_bias, bn_n, wf, bf_bias, bn_c,
                          matmul_dtype=jnp.float32, io_dtype=jnp.float32)
    out_f32 = jax.block_until_ready(out_f32)
    assert out_f32.shape == (B, C, N)
    assert jnp.allclose(out_f32, ref, atol=1e-5, rtol=1e-5), \
        "f32 kernel mismatch vs reference"

    # Fast path (defaults): bf16 MXU operands + bf16 I/O, f32 accumulation and
    # f32 residual / affine / ReLU epilogue in-kernel.  Weights folded once.
    params = fold_graphconv1d_params(wn, bn_bias, bn_n, wf, bf_bias, bn_c)
    out_fast = graphconv1d_apply(x, params)
    out_fast = jax.block_until_ready(out_fast)
    assert out_fast.shape == (B, C, N)
    assert out_fast.dtype == jnp.bfloat16
    assert jnp.allclose(out_fast.astype(jnp.float32), ref,
                        atol=1e-1, rtol=1e-1), \
        "bf16 kernel mismatch vs reference"

    print("KERNEL_OK")
</pallas_src>

<mosaic_0001>
module attributes {stable_mosaic.version = 11 : i64} {
  func.func @_graphconv1d_kernel(%arg0: i32, %arg1: memref<16x128xf32, #tpu.memory_space<vmem>>, %arg2: memref<16x16xf32, #tpu.memory_space<vmem>>, %arg3: memref<16x1xf32, #tpu.memory_space<vmem>>, %arg4: memref<128x128xf32, #tpu.memory_space<vmem>>, %arg5: memref<1x128xf32, #tpu.memory_space<vmem>>, %arg6: memref<16x128xf32, #tpu.memory_space<vmem>>, %arg7: memref<16x128xf32, #tpu.memory_space<vmem>>) attributes {dimension_semantics = [#tpu.dimension_semantics<parallel>], iteration_bounds = array<i64: 2>, scalar_prefetch = 0 : i64, scratch_operands = 1 : i64, tpu.core_type = #tpu.core_type<tc>, window_params = [{transform_indices = @transform_0, window_bounds = array<i64: 16, 128>}, {pipeline_mode = #tpu.pipeline_mode<synchronous>, transform_indices = @transform_1, window_bounds = array<i64: 16, 16>}, {pipeline_mode = #tpu.pipeline_mode<synchronous>, transform_indices = @transform_2, window_bounds = array<i64: 16, 1>}, {pipeline_mode = #tpu.pipeline_mode<synchronous>, transform_indices = @transform_3, window_bounds = array<i64: 128, 128>}, {pipeline_mode = #tpu.pipeline_mode<synchronous>, transform_indices = @transform_4, window_bounds = array<i64: 1, 128>}, {transform_indices = @transform_5, window_bounds = array<i64: 16, 128>}]} {
    %c0 = arith.constant 0 : index
    %c0_0 = arith.constant 0 : index
    %0 = vector.load %arg1[%c0, %c0_0] : memref<16x128xf32, #tpu.memory_space<vmem>>, vector<16x128xf32>
    %c0_1 = arith.constant 0 : index
    %c0_2 = arith.constant 0 : index
    %1 = vector.load %arg2[%c0_1, %c0_2] : memref<16x16xf32, #tpu.memory_space<vmem>>, vector<16x16xf32>
    %cst = arith.constant dense<0.000000e+00> : vector<16x128xf32>
    %2 = tpu.matmul %1, %0, %cst {dimension_numbers = #tpu.dot_dimension_numbers<[1], [0], [0], [1], [0, 0, 1, 1], [], []>} : vector<16x16xf32>, vector<16x128xf32>, vector<16x128xf32> -> vector<16x128xf32>
    %c0_3 = arith.constant 0 : index
    %c0_4 = arith.constant 0 : index
    %3 = vector.load %arg3[%c0_3, %c0_4] : memref<16x1xf32, #tpu.memory_space<vmem>>, vector<16x1xf32>
    %4 = vector.broadcast %3 : vector<16x1xf32> to vector<16x128xf32>
    %5 = arith.addf %2, %4 : vector<16x128xf32>
    %cst_5 = arith.constant 0.000000e+00 : f32
    %6 = vector.broadcast %cst_5 : f32 to vector<16x128xf32>
    %7 = arith.maximumf %5, %6 : vector<16x128xf32>
    %8 = arith.addf %7, %0 : vector<16x128xf32>
    %c0_6 = arith.constant 0 : index
    %c0_7 = arith.constant 0 : index
    %9 = vector.load %arg7[%c0_6, %c0_7] : memref<16x128xf32, #tpu.memory_space<vmem>>, vector<16x128xf32>
    tpu.vector_store %arg7[%c0_6, %c0_7], %8 {strides = array<i32>} : memref<16x128xf32, #tpu.memory_space<vmem>>, vector<16x128xf32>,
    %c0_8 = arith.constant 0 : index
    %c0_9 = arith.constant 0 : index
    %10 = vector.load %arg7[%c0_8, %c0_9] : memref<16x128xf32, #tpu.memory_space<vmem>>, vector<16x128xf32>
    %c0_10 = arith.constant 0 : index
    %c0_11 = arith.constant 0 : index
    %11 = vector.load %arg4[%c0_10, %c0_11] : memref<128x128xf32, #tpu.memory_space<vmem>>, vector<128x128xf32>
    %cst_12 = arith.constant dense<0.000000e+00> : vector<16x128xf32>
    %12 = tpu.matmul %10, %11, %cst_12 {dimension_numbers = #tpu.dot_dimension_numbers<[1], [0], [0], [1], [0, 0, 1, 1], [], []>} : vector<16x128xf32>, vector<128x128xf32>, vector<16x128xf32> -> vector<16x128xf32>
    %c0_13 = arith.constant 0 : index
    %c0_14 = arith.constant 0 : index
    %13 = vector.load %arg5[%c0_13, %c0_14] : memref<1x128xf32, #tpu.memory_space<vmem>>, vector<1x128xf32>
    %14 = vector.broadcast %13 : vector<1x128xf32> to vector<16x128xf32>
    %15 = arith.addf %12, %14 : vector<16x128xf32>
    %cst_15 = arith.constant 0.000000e+00 : f32
    %16 = vector.broadcast %cst_15 : f32 to vector<16x128xf32>
    %17 = arith.maximumf %15, %16 : vector<16x128xf32>
    %c0_16 = arith.constant 0 : index
    %c0_17 = arith.constant 0 : index
    %18 = vector.load %arg6[%c0_16, %c0_17] : memref<16x128xf32, #tpu.memory_space<vmem>>, vector<16x128xf32>
    tpu.vector_store %arg6[%c0_16, %c0_17], %17 {strides = array<i32>} : memref<16x128xf32, #tpu.memory_space<vmem>>, vector<16x128xf32>,
    return
  }
  func.func @transform_0(%arg0: i32) -> (i32, i32) {
    %c0_i32 = arith.constant 0 : i32
    %c0_i32_0 = arith.constant 0 : i32
    return %arg0, %c0_i32 : i32, i32
  }
  func.func @transform_1(%arg0: i32) -> (i32, i32) {
    %c0_i32 = arith.constant 0 : i32
    %c0_i32_0 = arith.constant 0 : i32
    %c0_i32_1 = arith.constant 0 : i32
    return %c0_i32, %c0_i32_0 : i32, i32
  }
  func.func @transform_2(%arg0: i32) -> (i32, i32) {
    %c0_i32 = arith.constant 0 : i32
    %c0_i32_0 = arith.constant 0 : i32
    %c0_i32_1 = arith.constant 0 : i32
    return %c0_i32, %c0_i32_0 : i32, i32
  }
  func.func @transform_3(%arg0: i32) -> (i32, i32) {
    %c0_i32 = arith.constant 0 : i32
    %c0_i32_0 = arith.constant 0 : i32
    %c0_i32_1 = arith.constant 0 : i32
    return %c0_i32, %c0_i32_0 : i32, i32
  }
  func.func @transform_4(%arg0: i32) -> (i32, i32) {
    %c0_i32 = arith.constant 0 : i32
    %c0_i32_0 = arith.constant 0 : i32
    %c0_i32_1 = arith.constant 0 : i32
    return %c0_i32, %c0_i32_0 : i32, i32
  }
  func.func @transform_5(%arg0: i32) -> (i32, i32) {
    %c0_i32 = arith.constant 0 : i32
    %c0_i32_0 = arith.constant 0 : i32
    return %arg0, %c0_i32 : i32, i32
  }
}

module attributes {stable_mosaic.version = 11 : i64} {
  func.func @_graphconv1d_kernel(%arg0: i32, %arg1: memref<16x128xf32, #tpu.memory_space<vmem>>, %arg2: memref<16x16xf32, #tpu.memory_space<vmem>>, %arg3: memref<16x1xf32, #tpu.memory_space<vmem>>, %arg4: memref<128x128xf32, #tpu.memory_space<vmem>>, %arg5: memref<1x128xf32, #tpu.memory_space<vmem>>, %arg6: memref<16x128xf32, #tpu.memory_space<vmem>>, %arg7: memref<16x128xf32, #tpu.memory_space<vmem>>) attributes {dimension_semantics = [#tpu.dimension_semantics<parallel>], iteration_bounds = array<i64: 2>, scalar_prefetch = 0 : i64, scratch_operands = 1 : i64, tpu.core_type = #tpu.core_type<tc>, window_params = [{transform_indices = @transform_0, window_bounds = array<i64: 16, 128>}, {pipeline_mode = #tpu.pipeline_mode<synchronous>, transform_indices = @transform_1, window_bounds = array<i64: 16, 16>}, {pipeline_mode = #tpu.pipeline_mode<synchronous>, transform_indices = @transform_2, window_bounds = array<i64: 16, 1>}, {pipeline_mode = #tpu.pipeline_mode<synchronous>, transform_indices = @transform_3, window_bounds = array<i64: 128, 128>}, {pipeline_mode = #tpu.pipeline_mode<synchronous>, transform_indices = @transform_4, window_bounds = array<i64: 1, 128>}, {transform_indices = @transform_5, window_bounds = array<i64: 16, 128>}]} {
    %c0 = arith.constant 0 : index
    %c0_0 = arith.constant 0 : index
    %0 = vector.load %arg1[%c0, %c0_0] : memref<16x128xf32, #tpu.memory_space<vmem>>, vector<16x128xf32>
    %c0_1 = arith.constant 0 : index
    %c0_2 = arith.constant 0 : index
    %1 = vector.load %arg2[%c0_1, %c0_2] : memref<16x16xf32, #tpu.memory_space<vmem>>, vector<16x16xf32>
    %cst = arith.constant dense<0.000000e+00> : vector<16x128xf32>
    %2 = tpu.matmul %1, %0, %cst {dimension_numbers = #tpu.dot_dimension_numbers<[1], [0], [0], [1], [0, 0, 1, 1], [], []>} : vector<16x16xf32>, vector<16x128xf32>, vector<16x128xf32> -> vector<16x128xf32>
    %c0_3 = arith.constant 0 : index
    %c0_4 = arith.constant 0 : index
    %3 = vector.load %arg3[%c0_3, %c0_4] : memref<16x1xf32, #tpu.memory_space<vmem>>, vector<16x1xf32>
    %4 = vector.broadcast %3 : vector<16x1xf32> to vector<16x128xf32>
    %5 = arith.addf %2, %4 : vector<16x128xf32>
    %cst_5 = arith.constant 0.000000e+00 : f32
    %6 = vector.broadcast %cst_5 : f32 to vector<16x128xf32>
    %7 = arith.maximumf %5, %6 : vector<16x128xf32>
    %8 = arith.addf %7, %0 : vector<16x128xf32>
    %c0_6 = arith.constant 0 : index
    %c0_7 = arith.constant 0 : index
    %9 = vector.load %arg7[%c0_6, %c0_7] : memref<16x128xf32, #tpu.memory_space<vmem>>, vector<16x128xf32>
    tpu.vector_store %arg7[%c0_6, %c0_7], %8 {strides = array<i32>} : memref<16x128xf32, #tpu.memory_space<vmem>>, vector<16x128xf32>,
    %c0_8 = arith.constant 0 : index
    %c0_9 = arith.constant 0 : index
    %10 = vector.load %arg7[%c0_8, %c0_9] : memref<16x128xf32, #tpu.memory_space<vmem>>, vector<16x128xf32>
    %c0_10 = arith.constant 0 : index
    %c0_11 = arith.constant 0 : index
    %11 = vector.load %arg4[%c0_10, %c0_11] : memref<128x128xf32, #tpu.memory_space<vmem>>, vector<128x128xf32>
    %cst_12 = arith.constant dense<0.000000e+00> : vector<16x128xf32>
    %12 = tpu.matmul %10, %11, %cst_12 {dimension_numbers = #tpu.dot_dimension_numbers<[1], [0], [0], [1], [0, 0, 1, 1], [], []>} : vector<16x128xf32>, vector<128x128xf32>, vector<16x128xf32> -> vector<16x128xf32>
    %c0_13 = arith.constant 0 : index
    %c0_14 = arith.constant 0 : index
    %13 = vector.load %arg5[%c0_13, %c0_14] : memref<1x128xf32, #tpu.memory_space<vmem>>, vector<1x128xf32>
    %14 = vector.broadcast %13 : vector<1x128xf32> to vector<16x128xf32>
    %15 = arith.addf %12, %14 : vector<16x128xf32>
    %cst_15 = arith.constant 0.000000e+00 : f32
    %16 = vector.broadcast %cst_15 : f32 to vector<16x128xf32>
    %17 = arith.maximumf %15, %16 : vector<16x128xf32>
    %c0_16 = arith.constant 0 : index
    %c0_17 = arith.constant 0 : index
    %18 = vector.load %arg6[%c0_16, %c0_17] : memref<16x128xf32, #tpu.memory_space<vmem>>, vector<16x128xf32>
    tpu.vector_store %arg6[%c0_16, %c0_17], %17 {strides = array<i32>} : memref<16x128xf32, #tpu.memory_space<vmem>>, vector<16x128xf32>,
    return
  }
  func.func @transform_0(%arg0: i32) -> (i32, i32) {
    %c0_i32 = arith.constant 0 : i32
    %c0_i32_0 = arith.constant 0 : i32
    return %arg0, %c0_i32 : i32, i32
  }
  func.func @transform_1(%arg0: i32) -> (i32, i32) {
    %c0_i32 = arith.constant 0 : i32
    %c0_i32_0 = arith.constant 0 : i32
    %c0_i32_1 = arith.constant 0 : i32
    return %c0_i32, %c0_i32_0 : i32, i32
  }
  func.func @transform_2(%arg0: i32) -> (i32, i32) {
    %c0_i32 = arith.constant 0 : i32
    %c0_i32_0 = arith.constant 0 : i32
    %c0_i32_1 = arith.constant 0 : i32
    return %c0_i32, %c0_i32_0 : i32, i32
  }
  func.func @transform_3(%arg0: i32) -> (i32, i32) {
    %c0_i32 = arith.constant 0 : i32
    %c0_i32_0 = arith.constant 0 : i32
    %c0_i32_1 = arith.constant 0 : i32
    return %c0_i32, %c0_i32_0 : i32, i32
  }
  func.func @transform_4(%arg0: i32) -> (i32, i32) {
    %c0_i32 = arith.constant 0 : i32
    %c0_i32_0 = arith.constant 0 : i32
    %c0_i32_1 = arith.constant 0 : i32
    return %c0_i32, %c0_i32_0 : i32, i32
  }
  func.func @transform_5(%arg0: i32) -> (i32, i32) {
    %c0_i32 = arith.constant 0 : i32
    %c0_i32_0 = arith.constant 0 : i32
    return %arg0, %c0_i32 : i32, i32
  }
}

</mosaic_0001>

<bundles_post_ra>
// kernel: tpu_custom_call.1
= control target key start
LH: loop header
LB: loop body
LE: loop exit
PB: predicated region body
PF: predicated region fallthrough
CT: control target
= control target key end

     0   :  { %10 = vsyncpa [#allocation4], 0  ;;  %s905_s0 = inlined_call_operand.hbm [shape: f32[32,128], index: 0, kind: input, shape index: {}]   ;;  %s906_s1 = inlined_call_operand.vmem [shape: f32[16,16], index: 1, kind: input, shape index: {}]   ;;  %s907_s2 = inlined_call_operand.vmem [shape: f32[16,1], index: 2, kind: input, shape index: {}]   ;;  %s908_s3 = inlined_call_operand.hbm [shape: f32[128,128], index: 3, kind: input, shape index: {}]   ;;  %s909_s4 = inlined_call_operand.vmem [shape: f32[1,128], index: 4, kind: input, shape index: {}]   ;;  %s910_s5 = inlined_call_operand.hbm [shape: f32[32,128], index: 5, kind: output, shape index: {}]  }
   0x1   :  { %12 = vsyncpa [#allocation4 + $0x1], 0 }
   0x2   :  { %13 = vsyncpa [#allocation7], 0 }
   0x3   :  { %14 = vsyncpa [#allocation5], 0 }
   0x4   :  { %16 = vsyncpa [#allocation5 + $0x1], 0  ;;  %s732_s18 = smov 0   ;;  %s734_s19 = smov 0  }
   0x5   :  { %s736_s20 = smov 0   ;;  %s738_s21 = smov 0  }
   0x6 LB: > { %s753_s22 = sadd.s32 4294967295, %s694_s21   ;;  %s464_s23 = sadd.s32 4294967294, %s694_s21   ;;  %s694_s21 = sphi %s738_s21, %s922_s21   ;;  %s690_s20 = sphi %s736_s20, %s921_s20   ;;  %s686_s19 = sphi %s734_s19, %s920_s19   ;;  %s682_s18 = sphi %s732_s18, %s919_s18  }
   0x7   : > { %p42_p0 = scmp.ne.s32.totalorder %s686_s19, %s682_s18  ;;  %p43_p1 = scmp.eq.s32.totalorder %s753_s22, 0 }
   0x8   : > { %p150_p2 = scmp.eq.s32.totalorder %s753_s22, 1  ;;  %p156_p3 = scmp.eq.s32.totalorder %s464_s23, 1 }
   0x9   : > { %p762_p4 = por %p43_p1, %p42_p0  ;;  %p465_p5 = scmp.ge.s32.totalorder %s694_s21, 1 }
   0xa   : > { %p767_p6 = por %p156_p3, %p42_p0  ;;  %p163_p7 = scmp.lt.s32.totalorder %s694_s21, 3 }
   0xb   : > { %s180_s28 = sshll.u32 %s908_s3, 4  ;;  %s696_s30 = smov [#allocation6]   ;;  %s181_s28 = int_to_ptr.hbm [resolvable:$true] %s180_s28 }
   0xc   : > { %p775_p8 = pnand %p465_p5, %p163_p7  ;;  %s182_s6 = sshll.u32 %s696_s30, 4  ;;  %s183_s6 = int_to_ptr.vmem [resolvable:$true] %s182_s6 }
   0xd   : > { %s785_s7 = sadd.s32 1, %s694_s21   ;;  %s911_s8 = smov 128  }
   0xe   : > { %p508_p9 = pneg %p775_p8  ;;  %s698_s9 = smov 8  }
   0xf   : > { %s26_s10 = ssub.s32 %s694_s21, %s785_s7  ;;  %s29_s11 = sadd.s32 1, %s690_s20 }
  0x10   : > { %p509_p10 = pnand %p508_p9, %p43_p1  ;;  %p27_p12 = scmp.eq.s32.totalorder %s26_s10, 0 }
  0x11   : > { %p36_p13 = scmp.ne.s32.totalorder %s690_s20, %s686_s19  ;;  %p37_p0 = scmp.eq.s32.totalorder %s694_s21, 0 }
  0x12   : > { %511 = dma.hbm_to_vmem [thread:$0]  (!%p509_p10), %s181_s28, 2048, %s183_s6, [#allocation7], %s911_s8, %s911_s8, %s698_s9  }
  0x13   : > { %s797_s12 = scalar_select %p27_p12, %s690_s20, %s29_s11  }
  0x14   : > { %p801_p3 = por %p150_p2, %p36_p13  ;;  %p521_p5 = scmp.lt.s32.totalorder %s694_s21, 2 }
  0x15   : > { %s199_s14 = sand.u32 1, %s690_s20   ;;  %s482_s15 = sshll.u32 %s694_s21, 4 }
  0x16   : > { %p38_p7 = por %p37_p0, %p36_p13  ;;  %s468_s16 = sshll.u32 %s199_s14, 4 }
  0x17   : > { %s208_s26 = scalar_lea.hbm %s905_s0, %s482_s15  ;;  %s203_s28 = scalar_lea.vmem [#allocation3], %s468_s16 }
  0x18   : > { %s209_s27 = sshll.u32 %s208_s26, 4  ;;  %s211_s30 = sshll.u32 %s203_s28, 4  ;;  %s210_s27 = int_to_ptr.hbm [resolvable:$true] %s209_s27  ;;  %s212_s30 = int_to_ptr.vmem [resolvable:$true] %s211_s30 }
  0x19   : > { %p811_p9 = pnand %p521_p5, %p38_p7  ;;  %s200_s10 = scalar_lea.sflag [#allocation4], %s199_s14 }
  0x1a   : > { %s594_s11 = sshra.s32 %s210_s27, 4  ;;  %s601_s16 = scalar_lea.hbm %s905_s0, 32  ;;  %s595_s11 = int_to_ptr.hbm [resolvable:$true] %s594_s11 }
  0x1b   : > { %s596_s8 = scalar_lea.hbm %s595_s11, 16  ;;  %p598_p10 = pneg %p811_p9 }
  0x1c   : > { %p597_p2 = scmp.ne.s32.totalorder %s595_s11, %s596_s8  ;;  %p602_p0 = scmp.lt.s32.totalorder %s595_s11, %s905_s0 }
  0x1d   : > { %p603_p5 = scmp.lt.s32.totalorder %s601_s16, %s596_s8 }
  0x1e   : > { %p599_p12 = pnand %p598_p10, %p597_p2 }
  0x1f   : > { %p604_p7 = por %p603_p5, %p602_p0 }
  0x20   : > { %p600_p13 = pneg %p599_p12 }
  0x22   : > { %p605_p11 = pnand %p604_p7, %p600_p13 }
  0x24   : > { %608 = shalt.err (!%p605_p11)
}
  0x25   : > { %s917_s14 = smov 128   ;;  %223 = sbr.rel (%p775_p8) target bundleno = 329 (0x149), region = 40 }
  0x26   : > { %515 = dma.hbm_to_vmem [thread:$0]  (!%p811_p9), %s210_s27, 256, %s212_s30, %s200_s10, %s917_s14, %s917_s14, %s698_s9  }
  0x27   : > { %s831_s28 = sand.u32 (!%p775_p8), 1, %s686_s19  }
  0x28   : > { %s472_s8 = sshll.u32 (!%p775_p8), %s831_s28, 4  ;;  %s226_s11 = scalar_lea.sflag (!%p775_p8), [#allocation4], %s831_s28 }
  0x29   : > { %s229_s15 = scalar_lea.vmem (!%p775_p8), [#allocation3], %s472_s8 }
  0x2a   : > { %669 = dma.done.wait (%p762_p4), %s226_s11, 256  }
  0x2b   : > { %671 = vsyncadd (%p762_p4), %s226_s11, 4294967040 }
  0x2c   : > { %673 = dma.done.wait (%p43_p1), [#allocation7], 2048  }
  0x2d   : > { %675 = vsyncadd (%p43_p1), [#allocation7], 4294965248  ;;  %v699_v0 = vmov 0   ;;  %v845_v1 = vld [vmem:[%s229_s15 + $0x8] sm:$0xff]  ;;  %v847_v2 = vld [vmem:[%s229_s15] sm:$0xff]  ;;  %vm280_vm0 = vcmask 130048  }
  0x2e   : > { %562 = vset.pattern.permute.xlu0 %v699_v0  ;;  %301 = vmatpush.msra.mxu0 %v845_v1  ;;  %v266_v3 = vld [vmem:[%s906_s1] sm:$0xff]  ;;  %v269_v4 = vld [vmem:[%s907_s2 + $0x8] sm:$0xff]  ;;  %v333_v5 = vld [vmem:[#allocation6 + $0x78] sm:$0xff]  ;;  %s261_s26 = scalar_lea.vmem [#allocation8], %s472_s8  ;;  %s483_s14 = sshll.u32 %s753_s22, 4 }
  0x2f   : > { %277 = vperm.xlu0 %562, %v269_v4   ;;  %v332_v6 = vld [vmem:[#allocation6 + $0x70] sm:$0xff]  ;;  %338 = vmatpush.msra.mxu1 %v333_v5  ;;  %v331_v7 = vld [vmem:[#allocation6 + $0x68] sm:$0xff]  ;;  %v330_v8 = vld [vmem:[#allocation6 + $0x60] sm:$0xff]  ;;  %s377_s29 = scalar_lea.hbm %s910_s5, %s483_s14  ;;  %s378_s9 = sshll.u32 %s261_s26, 4  ;;  %s379_s9 = int_to_ptr.vmem [resolvable:$true] %s378_s9 }
  0x30   : > { %302 = vmatpush.msra.mxu0 %v847_v2  ;;  %484 = vmatpush.msra.mxu2 %v333_v5  ;;  %v268_v9 = vld [vmem:[%s907_s2] sm:$0xff]  ;;  %v329_v10 = vld [vmem:[#allocation6 + $0x58] sm:$0xff]  ;;  %v267_v11 = vld [vmem:[%s906_s1 + $0x8] sm:$0xff]  ;;  %s380_s24 = sshll.u32 %s377_s29, 4  ;;  %s366_s27 = scalar_lea.sflag [#allocation5], %s831_s28  ;;  %s381_s24 = int_to_ptr.hbm [resolvable:$true] %s380_s24 }
  0x31   : > { %475 = vmatmul.msk.f32.vlgmr.msra.gmra.mxu0 %vm280_vm0, %v266_v3  ;;  %339 = vmatpush.msra.mxu1 %v332_v6  ;;  %v328_v12 = vld [vmem:[#allocation6 + $0x50] sm:$0xff]  ;;  %v327_v13 = vld [vmem:[#allocation6 + $0x48] sm:$0xff]  ;;  %v326_v14 = vld [vmem:[#allocation6 + $0x40] sm:$0xff]  ;;  %s638_s30 = sshra.s32 %s381_s24, 4  ;;  %s644_s10 = scalar_lea.hbm %s910_s5, 32  ;;  %s639_s30 = int_to_ptr.hbm [resolvable:$true] %s638_s30 }
  0x32   : > { %485 = vmatpush.msra.mxu2 %v332_v6  ;;  %v325_v15 = vld [vmem:[#allocation6 + $0x38] sm:$0xff]  ;;  %v324_v16 = vld [vmem:[#allocation6 + $0x30] sm:$0xff]  ;;  %v323_v17 = vld [vmem:[#allocation6 + $0x28] sm:$0xff]  ;;  %s640_s6 = scalar_lea.hbm %s639_s30, 16  ;;  %p645_p11 = scmp.lt.s32.totalorder %s639_s30, %s910_s5 }
  0x33   : > { %340 = vmatpush.msra.mxu1 %v331_v7  ;;  %v322_v18 = vld [vmem:[#allocation6 + $0x20] sm:$0xff]  ;;  %v321_v19 = vld [vmem:[#allocation6 + $0x18] sm:$0xff]  ;;  %v320_v20 = vld [vmem:[#allocation6 + $0x10] sm:$0xff]  ;;  %p641_p1 = scmp.ne.s32.totalorder %s639_s30, %s640_s6  ;;  %p646_p9 = scmp.lt.s32.totalorder %s644_s10, %s640_s6 }
  0x34   : > { %486 = vmatpush.msra.mxu2 %v331_v7  ;;  %v319_v21 = vld [vmem:[#allocation6 + $0x8] sm:$0xff]  ;;  %v318_v22 = vld [vmem:[#allocation6] sm:$0xff] }
  0x35   : > { %341 = vmatpush.msra.mxu1 %v330_v8  ;;  %v563_v33 = vld [vmem:[%s909_s4] ss:$0 sm:$0xff]  ;;  %p642_p4 = pnand %p641_p1, %p801_p3  ;;  %p647_p2 = por %p646_p9, %p645_p11 }
  0x36   : > { %487 = vmatpush.msra.mxu2 %v330_v8 }
  0x37   : > { %272 = vperm.xlu0 %562, %v268_v9   ;;  %342 = vmatpush.msra.mxu1 %v329_v10  ;;  %p643_p8 = pneg %p642_p4 }
  0x38   : > { %488 = vmatpush.msra.mxu2 %v329_v10 }
  0x39   : > { %476 = vmatmul.msk.f32.gmra.mxu0 %vm280_vm0, %v267_v11  ;;  %343 = vmatpush.msra.mxu1 %v328_v12  ;;  %p648_p10 = pnand %p647_p2, %p643_p8 }
  0x3a   : > { %489 = vmatpush.msra.mxu2 %v328_v12 }
  0x3b   : > { %344 = vmatpush.msra.mxu1 %v327_v13 }
  0x3c   : > { %490 = vmatpush.msra.mxu2 %v327_v13 }
  0x3d   : > { %345 = vmatpush.msra.mxu1 %v326_v14 }
  0x3e   : > { %491 = vmatpush.msra.mxu2 %v326_v14 }
  0x3f   : > { %346 = vmatpush.msra.mxu1 %v325_v15 }
  0x40   : > { %492 = vmatpush.msra.mxu2 %v325_v15 }
  0x41   : > { %347 = vmatpush.msra.mxu1 %v324_v16 }
  0x42   : > { %493 = vmatpush.msra.mxu2 %v324_v16 }
  0x43   : > { %348 = vmatpush.msra.mxu1 %v323_v17 }
  0x44   : > { %494 = vmatpush.msra.mxu2 %v323_v17 }
  0x45   : > { %349 = vmatpush.msra.mxu1 %v322_v18 }
  0x46   : > { %495 = vmatpush.msra.mxu2 %v322_v18 }
  0x47   : > { %350 = vmatpush.msra.mxu1 %v321_v19 }
  0x48   : > { %496 = vmatpush.msra.mxu2 %v321_v19 }
  0x49   : > { %351 = vmatpush.msra.mxu1 %v320_v20 }
  0x4a   : > { %497 = vmatpush.msra.mxu2 %v320_v20 }
  0x4b   : > { %352 = vmatpush.msra.mxu1 %v319_v21 }
  0x4c   : > { %498 = vmatpush.msra.mxu2 %v319_v21 }
  0x4d   : > { %353 = vmatpush.msra.mxu1 %v318_v22 }
  0x4e   : > { %499 = vmatpush.msra.mxu2 %v318_v22 }
  0xa1   : > { %v278_v23 = vpop.permute.xlu0 %277 }
  0xa9   : > { %v273_v24 = vpop.permute.xlu0 %272 }
  0xae   : > { %v304_v25 = vpop.f32.mrf.mxu0 }
  0xaf   : > { %v305_v26 = vadd.f32 %v304_v25, %v273_v24 }
  0xb1   : > { %v310_v27 = vmax.f32 %v305_v26, 0.0 }
  0xb3   : > { %v312_v28 = vadd.f32 %v310_v27, %v847_v2 }
  0xb5   : > { %354 = vmatmul.f32.vlgmr.msra.gmra.mxu1 %v312_v28 }
  0xb6   : > { %v307_v29 = vpop.f32.mrf.mxu0 }
  0xb7   : > { %v308_v30 = vadd.f32 %v307_v29, %v278_v23 }
  0xb9   : > { %v311_v31 = vmax.f32 %v308_v30, 0.0 }
  0xbb   : > { %v313_v32 = vadd.f32 %v311_v31, %v845_v1 }
  0xbd   : > { %357 = vmatmul.f32.vlgmr.msra.gmra.mxu2 %v313_v32 }
 0x132   : > { %v355_v34 = vpop.f32.mrf.mxu1 }
 0x133   : > { %v356_v35 = vadd.f32 %v563_v33, %v355_v34 }
 0x135   : > { %v361_v36 = vmax.f32 %v356_v35, 0.0 }
 0x137   : > { %363 = vst [vmem:[%s261_s26] sm:$0xff] %v361_v36 }
 0x140   : > { %v358_v37 = vpop.f32.mrf.mxu2 }
 0x141   : > { %v359_v38 = vadd.f32 %v563_v33, %v358_v37 }
 0x143   : > { %v362_v39 = vmax.f32 %v359_v38, 0.0 }
 0x145   : > { %364 = vst [vmem:[%s261_s26 + $0x8] sm:$0xff] %v362_v39 }
 0x146   : > { %651 = shalt.err (!%p648_p10)
}
 0x147   : > { %s700_s28 = smov 128   ;;  %s701_s23 = smov 8  }
 0x148   : > { %506 = dma.vmem_to_hbm [thread:$0]  (%p801_p3), %s379_s9, 256, %s381_s24, %s366_s27, %s700_s28, %s700_s28, %s701_s23  }
 0x149 PF: > { %s395_s26 = sand.u32 1, %s682_s18   ;;  %p918_p12 = scmp.ge.s32.totalorder %s694_s21, 2 }
 0x14a   : > { %s396_s14 = scalar_lea.sflag [#allocation5], %s395_s26 }
 0x14b   : > { %p517_p13 = pnand %p918_p12, %p767_p6 }
 0x14d   : > { %p518_p0 = pneg %p517_p13 }
 0x14f   : > { %677 = dma.done.wait (%p518_p0), %s396_s14, 256  }
 0x150   : > { %679 = vsyncadd (%p518_p0), %s396_s14, 4294967040  ;;  %p19_p5 = scmp.ge.s32.totalorder %s785_s7, 4   ;;  %s919_s18 = smov %s686_s19 }
 0x151   : > { %s920_s19 = smov %s690_s20  ;;  %s921_s20 = smov %s797_s12 }
 0x152   : > { %s922_s21 = smov %s785_s7  ;;  %21 = sbr.rel (!%p19_p5) target bundleno = 6 (0x6), region = 89 }
 0x157   :  { %402 = vsyncpa [#allocation4], 1 }
 0x158   :  { %404 = vsyncpa [#allocation4 + $0x1], 1 }
 0x159   :  { %405 = vsyncpa [#allocation7], 1 }
 0x15a   :  { %406 = vsyncpa [#allocation5], 1 }
 0x15b   :  { %408 = vsyncpa [#allocation5 + $0x1], 1 }

// kernel: tpu_custom_call.1
= control target key start
LH: loop header
LB: loop body
LE: loop exit
PB: predicated region body
PF: predicated region fallthrough
CT: control target
= control target key end

     0   :  { %10 = vsyncpa [#allocation4], 0  ;;  %s905_s0 = inlined_call_operand.hbm [shape: f32[32,128], index: 0, kind: input, shape index: {}]   ;;  %s906_s1 = inlined_call_operand.vmem [shape: f32[16,16], index: 1, kind: input, shape index: {}]   ;;  %s907_s2 = inlined_call_operand.vmem [shape: f32[16,1], index: 2, kind: input, shape index: {}]   ;;  %s908_s3 = inlined_call_operand.hbm [shape: f32[128,128], index: 3, kind: input, shape index: {}]   ;;  %s909_s4 = inlined_call_operand.vmem [shape: f32[1,128], index: 4, kind: input, shape index: {}]   ;;  %s910_s5 = inlined_call_operand.hbm [shape: f32[32,128], index: 5, kind: output, shape index: {}]  }
   0x1   :  { %12 = vsyncpa [#allocation4 + $0x1], 0 }
   0x2   :  { %13 = vsyncpa [#allocation7], 0 }
   0x3   :  { %14 = vsyncpa [#allocation5], 0 }
   0x4   :  { %16 = vsyncpa [#allocation5 + $0x1], 0  ;;  %s732_s18 = smov 0   ;;  %s734_s19 = smov 0  }
   0x5   :  { %s736_s20 = smov 0   ;;  %s738_s21 = smov 0  }
   0x6 LB: > { %s753_s22 = sadd.s32 4294967295, %s694_s21   ;;  %s464_s23 = sadd.s32 4294967294, %s694_s21   ;;  %s694_s21 = sphi %s738_s21, %s922_s21   ;;  %s690_s20 = sphi %s736_s20, %s921_s20   ;;  %s686_s19 = sphi %s734_s19, %s920_s19   ;;  %s682_s18 = sphi %s732_s18, %s919_s18  }
   0x7   : > { %p42_p0 = scmp.ne.s32.totalorder %s686_s19, %s682_s18  ;;  %p43_p1 = scmp.eq.s32.totalorder %s753_s22, 0 }
   0x8   : > { %p150_p2 = scmp.eq.s32.totalorder %s753_s22, 1  ;;  %p156_p3 = scmp.eq.s32.totalorder %s464_s23, 1 }
   0x9   : > { %p762_p4 = por %p43_p1, %p42_p0  ;;  %p465_p5 = scmp.ge.s32.totalorder %s694_s21, 1 }
   0xa   : > { %p767_p6 = por %p156_p3, %p42_p0  ;;  %p163_p7 = scmp.lt.s32.totalorder %s694_s21, 3 }
   0xb   : > { %s180_s28 = sshll.u32 %s908_s3, 4  ;;  %s696_s30 = smov [#allocation6]   ;;  %s181_s28 = int_to_ptr.hbm [resolvable:$true] %s180_s28 }
   0xc   : > { %p775_p8 = pnand %p465_p5, %p163_p7  ;;  %s182_s6 = sshll.u32 %s696_s30, 4  ;;  %s183_s6 = int_to_ptr.vmem [resolvable:$true] %s182_s6 }
   0xd   : > { %s785_s7 = sadd.s32 1, %s694_s21   ;;  %s911_s8 = smov 128  }
   0xe   : > { %p508_p9 = pneg %p775_p8  ;;  %s698_s9 = smov 8  }
   0xf   : > { %s26_s10 = ssub.s32 %s694_s21, %s785_s7  ;;  %s29_s11 = sadd.s32 1, %s690_s20 }
  0x10   : > { %p509_p10 = pnand %p508_p9, %p43_p1  ;;  %p27_p12 = scmp.eq.s32.totalorder %s26_s10, 0 }
  0x11   : > { %p36_p13 = scmp.ne.s32.totalorder %s690_s20, %s686_s19  ;;  %p37_p0 = scmp.eq.s32.totalorder %s694_s21, 0 }
  0x12   : > { %511 = dma.hbm_to_vmem [thread:$0]  (!%p509_p10), %s181_s28, 2048, %s183_s6, [#allocation7], %s911_s8, %s911_s8, %s698_s9  }
  0x13   : > { %s797_s12 = scalar_select %p27_p12, %s690_s20, %s29_s11  }
  0x14   : > { %p801_p3 = por %p150_p2, %p36_p13  ;;  %p521_p5 = scmp.lt.s32.totalorder %s694_s21, 2 }
  0x15   : > { %s199_s14 = sand.u32 1, %s690_s20   ;;  %s482_s15 = sshll.u32 %s694_s21, 4 }
  0x16   : > { %p38_p7 = por %p37_p0, %p36_p13  ;;  %s468_s16 = sshll.u32 %s199_s14, 4 }
  0x17   : > { %s208_s26 = scalar_lea.hbm %s905_s0, %s482_s15  ;;  %s203_s28 = scalar_lea.vmem [#allocation3], %s468_s16 }
  0x18   : > { %s209_s27 = sshll.u32 %s208_s26, 4  ;;  %s211_s30 = sshll.u32 %s203_s28, 4  ;;  %s210_s27 = int_to_ptr.hbm [resolvable:$true] %s209_s27  ;;  %s212_s30 = int_to_ptr.vmem [resolvable:$true] %s211_s30 }
  0x19   : > { %p811_p9 = pnand %p521_p5, %p38_p7  ;;  %s200_s10 = scalar_lea.sflag [#allocation4], %s199_s14 }
  0x1a   : > { %s594_s11 = sshra.s32 %s210_s27, 4  ;;  %s601_s16 = scalar_lea.hbm %s905_s0, 32  ;;  %s595_s11 = int_to_ptr.hbm [resolvable:$true] %s594_s11 }
  0x1b   : > { %s596_s8 = scalar_lea.hbm %s595_s11, 16  ;;  %p598_p10 = pneg %p811_p9 }
  0x1c   : > { %p597_p2 = scmp.ne.s32.totalorder %s595_s11, %s596_s8  ;;  %p602_p0 = scmp.lt.s32.totalorder %s595_s11, %s905_s0 }
  0x1d   : > { %p603_p5 = scmp.lt.s32.totalorder %s601_s16, %s596_s8 }
  0x1e   : > { %p599_p12 = pnand %p598_p10, %p597_p2 }
  0x1f   : > { %p604_p7 = por %p603_p5, %p602_p0 }
  0x20   : > { %p600_p13 = pneg %p599_p12 }
  0x22   : > { %p605_p11 = pnand %p604_p7, %p600_p13 }
  0x24   : > { %608 = shalt.err (!%p605_p11)
}
  0x25   : > { %s917_s14 = smov 128   ;;  %223 = sbr.rel (%p775_p8) target bundleno = 329 (0x149), region = 40 }
  0x26   : > { %515 = dma.hbm_to_vmem [thread:$0]  (!%p811_p9), %s210_s27, 256, %s212_s30, %s200_s10, %s917_s14, %s917_s14, %s698_s9  }
  0x27   : > { %s831_s28 = sand.u32 (!%p775_p8), 1, %s686_s19  }
  0x28   : > { %s472_s8 = sshll.u32 (!%p775_p8), %s831_s28, 4  ;;  %s226_s11 = scalar_lea.sflag (!%p775_p8), [#allocation4], %s831_s28 }
  0x29   : > { %s229_s15 = scalar_lea.vmem (!%p775_p8), [#allocation3], %s472_s8 }
  0x2a   : > { %669 = dma.done.wait (%p762_p4), %s226_s11, 256  }
  0x2b   : > { %671 = vsyncadd (%p762_p4), %s226_s11, 4294967040 }
  0x2c   : > { %673 = dma.done.wait (%p43_p1), [#allocation7], 2048  }
  0x2d   : > { %675 = vsyncadd (%p43_p1), [#allocation7], 4294965248  ;;  %v699_v0 = vmov 0   ;;  %v845_v1 = vld [vmem:[%s229_s15 + $0x8] sm:$0xff]  ;;  %v847_v2 = vld [vmem:[%s229_s15] sm:$0xff]  ;;  %vm280_vm0 = vcmask 130048  }
  0x2e   : > { %562 = vset.pattern.permute.xlu0 %v699_v0  ;;  %301 = vmatpush.msra.mxu0 %v845_v1  ;;  %v266_v3 = vld [vmem:[%s906_s1] sm:$0xff]  ;;  %v269_v4 = vld [vmem:[%s907_s2 + $0x8] sm:$0xff]  ;;  %v333_v5 = vld [vmem:[#allocation6 + $0x78] sm:$0xff]  ;;  %s261_s26 = scalar_lea.vmem [#allocation8], %s472_s8  ;;  %s483_s14 = sshll.u32 %s753_s22, 4 }
  0x2f   : > { %277 = vperm.xlu0 %562, %v269_v4   ;;  %v332_v6 = vld [vmem:[#allocation6 + $0x70] sm:$0xff]  ;;  %338 = vmatpush.msra.mxu1 %v333_v5  ;;  %v331_v7 = vld [vmem:[#allocation6 + $0x68] sm:$0xff]  ;;  %v330_v8 = vld [vmem:[#allocation6 + $0x60] sm:$0xff]  ;;  %s377_s29 = scalar_lea.hbm %s910_s5, %s483_s14  ;;  %s378_s9 = sshll.u32 %s261_s26, 4  ;;  %s379_s9 = int_to_ptr.vmem [resolvable:$true] %s378_s9 }
  0x30   : > { %302 = vmatpush.msra.mxu0 %v847_v2  ;;  %484 = vmatpush.msra.mxu2 %v333_v5  ;;  %v268_v9 = vld [vmem:[%s907_s2] sm:$0xff]  ;;  %v329_v10 = vld [vmem:[#allocation6 + $0x58] sm:$0xff]  ;;  %v267_v11 = vld [vmem:[%s906_s1 + $0x8] sm:$0xff]  ;;  %s380_s24 = sshll.u32 %s377_s29, 4  ;;  %s366_s27 = scalar_lea.sflag [#allocation5], %s831_s28  ;;  %s381_s24 = int_to_ptr.hbm [resolvable:$true] %s380_s24 }
  0x31   : > { %475 = vmatmul.msk.f32.vlgmr.msra.gmra.mxu0 %vm280_vm0, %v266_v3  ;;  %339 = vmatpush.msra.mxu1 %v332_v6  ;;  %v328_v12 = vld [vmem:[#allocation6 + $0x50] sm:$0xff]  ;;  %v327_v13 = vld [vmem:[#allocation6 + $0x48] sm:$0xff]  ;;  %v326_v14 = vld [vmem:[#allocation6 + $0x40] sm:$0xff]  ;;  %s638_s30 = sshra.s32 %s381_s24, 4  ;;  %s644_s10 = scalar_lea.hbm %s910_s5, 32  ;;  %s639_s30 = int_to_ptr.hbm [resolvable:$true] %s638_s30 }
  0x32   : > { %485 = vmatpush.msra.mxu2 %v332_v6  ;;  %v325_v15 = vld [vmem:[#allocation6 + $0x38] sm:$0xff]  ;;  %v324_v16 = vld [vmem:[#allocation6 + $0x30] sm:$0xff]  ;;  %v323_v17 = vld [vmem:[#allocation6 + $0x28] sm:$0xff]  ;;  %s640_s6 = scalar_lea.hbm %s639_s30, 16  ;;  %p645_p11 = scmp.lt.s32.totalorder %s639_s30, %s910_s5 }
  0x33   : > { %340 = vmatpush.msra.mxu1 %v331_v7  ;;  %v322_v18 = vld [vmem:[#allocation6 + $0x20] sm:$0xff]  ;;  %v321_v19 = vld [vmem:[#allocation6 + $0x18] sm:$0xff]  ;;  %v320_v20 = vld [vmem:[#allocation6 + $0x10] sm:$0xff]  ;;  %p641_p1 = scmp.ne.s32.totalorder %s639_s30, %s640_s6  ;;  %p646_p9 = scmp.lt.s32.totalorder %s644_s10, %s640_s6 }
  0x34   : > { %486 = vmatpush.msra.mxu2 %v331_v7  ;;  %v319_v21 = vld [vmem:[#allocation6 + $0x8] sm:$0xff]  ;;  %v318_v22 = vld [vmem:[#allocation6] sm:$0xff] }
  0x35   : > { %341 = vmatpush.msra.mxu1 %v330_v8  ;;  %v563_v33 = vld [vmem:[%s909_s4] ss:$0 sm:$0xff]  ;;  %p642_p4 = pnand %p641_p1, %p801_p3  ;;  %p647_p2 = por %p646_p9, %p645_p11 }
  0x36   : > { %487 = vmatpush.msra.mxu2 %v330_v8 }
  0x37   : > { %272 = vperm.xlu0 %562, %v268_v9   ;;  %342 = vmatpush.msra.mxu1 %v329_v10  ;;  %p643_p8 = pneg %p642_p4 }
  0x38   : > { %488 = vmatpush.msra.mxu2 %v329_v10 }
  0x39   : > { %476 = vmatmul.msk.f32.gmra.mxu0 %vm280_vm0, %v267_v11  ;;  %343 = vmatpush.msra.mxu1 %v328_v12  ;;  %p648_p10 = pnand %p647_p2, %p643_p8 }
  0x3a   : > { %489 = vmatpush.msra.mxu2 %v328_v12 }
  0x3b   : > { %344 = vmatpush.msra.mxu1 %v327_v13 }
  0x3c   : > { %490 = vmatpush.msra.mxu2 %v327_v13 }
  0x3d   : > { %345 = vmatpush.msra.mxu1 %v326_v14 }
  0x3e   : > { %491 = vmatpush.msra.mxu2 %v326_v14 }
  0x3f   : > { %346 = vmatpush.msra.mxu1 %v325_v15 }
  0x40   : > { %492 = vmatpush.msra.mxu2 %v325_v15 }
  0x41   : > { %347 = vmatpush.msra.mxu1 %v324_v16 }
  0x42   : > { %493 = vmatpush.msra.mxu2 %v324_v16 }
  0x43   : > { %348 = vmatpush.msra.mxu1 %v323_v17 }
  0x44   : > { %494 = vmatpush.msra.mxu2 %v323_v17 }
  0x45   : > { %349 = vmatpush.msra.mxu1 %v322_v18 }
  0x46   : > { %495 = vmatpush.msra.mxu2 %v322_v18 }
  0x47   : > { %350 = vmatpush.msra.mxu1 %v321_v19 }
  0x48   : > { %496 = vmatpush.msra.mxu2 %v321_v19 }
  0x49   : > { %351 = vmatpush.msra.mxu1 %v320_v20 }
  0x4a   : > { %497 = vmatpush.msra.mxu2 %v320_v20 }
  0x4b   : > { %352 = vmatpush.msra.mxu1 %v319_v21 }
  0x4c   : > { %498 = vmatpush.msra.mxu2 %v319_v21 }
  0x4d   : > { %353 = vmatpush.msra.mxu1 %v318_v22 }
  0x4e   : > { %499 = vmatpush.msra.mxu2 %v318_v22 }
  0xa1   : > { %v278_v23 = vpop.permute.xlu0 %277 }
  0xa9   : > { %v273_v24 = vpop.permute.xlu0 %272 }
  0xae   : > { %v304_v25 = vpop.f32.mrf.mxu0 }
  0xaf   : > { %v305_v26 = vadd.f32 %v304_v25, %v273_v24 }
  0xb1   : > { %v310_v27 = vmax.f32 %v305_v26, 0.0 }
  0xb3   : > { %v312_v28 = vadd.f32 %v310_v27, %v847_v2 }
  0xb5   : > { %354 = vmatmul.f32.vlgmr.msra.gmra.mxu1 %v312_v28 }
  0xb6   : > { %v307_v29 = vpop.f32.mrf.mxu0 }
  0xb7   : > { %v308_v30 = vadd.f32 %v307_v29, %v278_v23 }
  0xb9   : > { %v311_v31 = vmax.f32 %v308_v30, 0.0 }
  0xbb   : > { %v313_v32 = vadd.f32 %v311_v31, %v845_v1 }
  0xbd   : > { %357 = vmatmul.f32.vlgmr.msra.gmra.mxu2 %v313_v32 }
 0x132   : > { %v355_v34 = vpop.f32.mrf.mxu1 }
 0x133   : > { %v356_v35 = vadd.f32 %v563_v33, %v355_v34 }
 0x135   : > { %v361_v36 = vmax.f32 %v356_v35, 0.0 }
 0x137   : > { %363 = vst [vmem:[%s261_s26] sm:$0xff] %v361_v36 }
 0x140   : > { %v358_v37 = vpop.f32.mrf.mxu2 }
 0x141   : > { %v359_v38 = vadd.f32 %v563_v33, %v358_v37 }
 0x143   : > { %v362_v39 = vmax.f32 %v359_v38, 0.0 }
 0x145   : > { %364 = vst [vmem:[%s261_s26 + $0x8] sm:$0xff] %v362_v39 }
 0x146   : > { %651 = shalt.err (!%p648_p10)
}
 0x147   : > { %s700_s28 = smov 128   ;;  %s701_s23 = smov 8  }
 0x148   : > { %506 = dma.vmem_to_hbm [thread:$0]  (%p801_p3), %s379_s9, 256, %s381_s24, %s366_s27, %s700_s28, %s700_s28, %s701_s23  }
 0x149 PF: > { %s395_s26 = sand.u32 1, %s682_s18   ;;  %p918_p12 = scmp.ge.s32.totalorder %s694_s21, 2 }
 0x14a   : > { %s396_s14 = scalar_lea.sflag [#allocation5], %s395_s26 }
 0x14b   : > { %p517_p13 = pnand %p918_p12, %p767_p6 }
 0x14d   : > { %p518_p0 = pneg %p517_p13 }
 0x14f   : > { %677 = dma.done.wait (%p518_p0), %s396_s14, 256  }
 0x150   : > { %679 = vsyncadd (%p518_p0), %s396_s14, 4294967040  ;;  %p19_p5 = scmp.ge.s32.totalorder %s785_s7, 4   ;;  %s919_s18 = smov %s686_s19 }
 0x151   : > { %s920_s19 = smov %s690_s20  ;;  %s921_s20 = smov %s797_s12 }
 0x152   : > { %s922_s21 = smov %s785_s7  ;;  %21 = sbr.rel (!%p19_p5) target bundleno = 6 (0x6), region = 89 }
 0x157   :  { %402 = vsyncpa [#allocation4], 1 }
 0x158   :  { %404 = vsyncpa [#allocation4 + $0x1], 1 }
 0x159   :  { %405 = vsyncpa [#allocation7], 1 }
 0x15a   :  { %406 = vsyncpa [#allocation5], 1 }
 0x15b   :  { %408 = vsyncpa [#allocation5 + $0x1], 1 }

</bundles_post_ra>
